<compile_context>
chip_gen: v7x
topology: tpu7x:2x2x1
jax: 0.10.0
libtpu: 0.0.40
codegen_flags: <defaults>
</compile_context>

<pallas_src>
import math

import jax
import jax.numpy as jnp
from jax.experimental import pallas as pl
from jax.experimental.pallas import tpu as pltpu


def _temporal_attention_kernel(x_ref, wqkv_ref, bqkv_ref, o_ref):
    nb, t, h = x_ref.shape
    cdt = wqkv_ref.dtype                        # MXU input dtype (bf16 by default)

    x = x_ref[...].reshape(nb * t, h).astype(cdt)
    w = wqkv_ref[...]                           # (H, 3H), already in cdt
    b = bqkv_ref[...].astype(jnp.float32)       # (1, 3H)

    # Fused QKV projection: one MXU matmul with a lane-dense (3H) output, f32 acc.
    qkv = jnp.dot(x, w, preferred_element_type=jnp.float32) + b    # (NB*T, 3H) f32
    qkv = qkv.reshape(nb, t, 3 * h)
    q = qkv[:, :, 0 * h:1 * h].astype(cdt)      # 1/sqrt(H) already folded into W_q/b_q
    k = qkv[:, :, 1 * h:2 * h].astype(cdt)
    v = qkv[:, :, 2 * h:3 * h].astype(cdt)

    # Scores: batched contraction on the last axes (no materialized k.T).
    s = jnp.einsum("bqh,bkh->bqk", q, k,
                   preferred_element_type=jnp.float32)              # (NB, T, T) f32

    # Numerically-stable softmax in f32; reciprocal on the (otherwise idle) EUP.
    s = s - jnp.max(s, axis=-1, keepdims=True)
    p = jnp.exp(s)
    denom = jnp.sum(p, axis=-1, keepdims=True)
    attn = p * pl.reciprocal(denom, approx=True)

    # dropout(attn) == identity in eval mode.

    out = jnp.einsum("bqk,bkh->bqh", attn.astype(cdt), v,
                     preferred_element_type=jnp.float32)            # (NB, T, H) f32
    o_ref[...] = out.astype(o_ref.dtype)


def _pick_batch_block(batch, seq):
    """Batch elements per grid step."""
    divisors = [d for d in range(1, batch + 1) if batch % d == 0]
    # Prefer filling the MXU sublane depth (256 on v6e/v7x, 128 on v5e) while
    # leaving >= 2 grid steps so both v7x TensorCores get work.
    for rows in (256, 128):
        for d in divisors:
            if d * seq >= rows and batch // d >= 2:
                return d
    # Cannot fill the MXU: take the largest block that still leaves >= 2 steps
    # (amortizes the ~0.35 us per-step pipeline overhead).
    for d in reversed(divisors):
        if batch // d >= 2:
            return d
    return batch


def prepare_qkv_params(wq, bq, wk, bk, wv, bv, compute_dtype=jnp.bfloat16):
    """Fuse PyTorch-layout (out,in) q/k/v Linear params into one (H, 3H) weight
    (in,out layout) and a (1, 3H) bias, folding the 1/sqrt(H) attention scale
    into the query columns.  Call once at parameter-load time, not per step."""
    h = wq.shape[0]
    scale = 1.0 / math.sqrt(h)
    wqkv = jnp.concatenate([wq.T * scale, wk.T, wv.T], axis=1).astype(compute_dtype)
    bqkv = jnp.concatenate([bq * scale, bk, bv]).reshape(1, 3 * h).astype(jnp.float32)
    return wqkv, bqkv


@jax.jit
def temporal_attention(x, wqkv, bqkv):
    """x: (B, T, H).  wqkv: (H, 3H) fused weight.  bqkv: (1, 3H) fused bias."""
    batch, seq, hidden = x.shape
    nb = _pick_batch_block(batch, seq)
    grid = (batch // nb,)

    flops = 2 * batch * seq * hidden * (3 * hidden + 2 * seq)
    bytes_accessed = (2 * x.size * x.dtype.itemsize            # x in + out
                      + wqkv.size * wqkv.dtype.itemsize
                      + bqkv.size * bqkv.dtype.itemsize)
    cost = pl.CostEstimate(flops=flops,
                           transcendentals=batch * seq * seq,
                           bytes_accessed=bytes_accessed)

    return pl.pallas_call(
        _temporal_attention_kernel,
        out_shape=jax.ShapeDtypeStruct((batch, seq, hidden), x.dtype),
        grid_spec=pltpu.PrefetchScalarGridSpec(
            num_scalar_prefetch=0,
            grid=grid,
            in_specs=[
                pl.BlockSpec((nb, seq, hidden), lambda b: (b, 0, 0)),   # x
                pl.BlockSpec((hidden, 3 * hidden), lambda b: (0, 0)),   # fused W_qkv
                pl.BlockSpec((1, 3 * hidden), lambda b: (0, 0)),        # fused bias
            ],
            out_specs=pl.BlockSpec((nb, seq, hidden), lambda b: (b, 0, 0)),
        ),
        compiler_params=pltpu.CompilerParams(
            dimension_semantics=("parallel",),
            vmem_limit_bytes=32 * 1024 * 1024),
        cost_estimate=cost,
    )(x, wqkv, bqkv)


def temporal_attention_ref(x, wq, bq, wk, bk, wv, bv):
    q = x @ wq.T + bq
    k = x @ wk.T + bk
    v = x @ wv.T + bv
    s = (q @ jnp.swapaxes(k, -2, -1)) / math.sqrt(q.shape[-1])
    a = jax.nn.softmax(s, axis=-1)
    return a @ v


if __name__ == "__main__":
    B, T, H = 2, 8, 32  # batch, seq(time), hidden

    key = jax.random.PRNGKey(0)
    kx, kq, kbq, kk, kbk, kv_, kbv = jax.random.split(key, 7)

    x = jax.random.normal(kx, (B, T, H), dtype=jnp.float32)

    # nn.Linear default init: U(-1/sqrt(H), 1/sqrt(H)) for weight and bias.
    bound = 1.0 / math.sqrt(H)
    wq = jax.random.uniform(kq, (H, H), jnp.float32, -bound, bound)
    bq = jax.random.uniform(kbq, (H,), jnp.float32, -bound, bound)
    wk = jax.random.uniform(kk, (H, H), jnp.float32, -bound, bound)
    bk = jax.random.uniform(kbk, (H,), jnp.float32, -bound, bound)
    wv = jax.random.uniform(kv_, (H, H), jnp.float32, -bound, bound)
    bv = jax.random.uniform(kbv, (H,), jnp.float32, -bound, bound)

    # Fuse / pre-transpose / scale-fold the parameters ONCE (not per call).
    wqkv, bqkv = prepare_qkv_params(wq, bq, wk, bk, wv, bv)

    out = jax.block_until_ready(temporal_attention(x, wqkv, bqkv))
    ref = temporal_attention_ref(x, wq, bq, wk, bk, wv, bv)

    assert out.shape == (B, T, H)
    # bf16 MXU inputs with f32 accumulation & f32 softmax: tolerance sized for bf16.
    assert jnp.allclose(out, ref, atol=3e-2, rtol=3e-2), (
        "mismatch vs reference, max abs err = "
        f"{float(jnp.max(jnp.abs(out - ref)))}")

    print("KERNEL_OK")
</pallas_src>

<mosaic_0001>
module attributes {stable_mosaic.version = 11 : i64} {
  func.func @_temporal_attention_kernel(%arg0: i32, %arg1: memref<1x8x32xf32, #tpu.memory_space<vmem>>, %arg2: memref<32x96xbf16, #tpu.memory_space<vmem>>, %arg3: memref<1x96xf32, #tpu.memory_space<vmem>>, %arg4: memref<1x8x32xf32, #tpu.memory_space<vmem>>) attributes {dimension_semantics = [#tpu.dimension_semantics<parallel>], iteration_bounds = array<i64: 2>, scalar_prefetch = 0 : i64, scratch_operands = 0 : i64, tpu.core_type = #tpu.core_type<tc>, window_params = [{transform_indices = @transform_0, window_bounds = array<i64: 1, 8, 32>}, {pipeline_mode = #tpu.pipeline_mode<synchronous>, transform_indices = @transform_1, window_bounds = array<i64: 32, 96>}, {pipeline_mode = #tpu.pipeline_mode<synchronous>, transform_indices = @transform_2, window_bounds = array<i64: 1, 96>}, {transform_indices = @transform_3, window_bounds = array<i64: 1, 8, 32>}]} {
    %c0 = arith.constant 0 : index
    %c0_0 = arith.constant 0 : index
    %c0_1 = arith.constant 0 : index
    %0 = vector.load %arg1[%c0, %c0_0, %c0_1] : memref<1x8x32xf32, #tpu.memory_space<vmem>>, vector<1x8x32xf32>
    %1 = vector.shape_cast %0 : vector<1x8x32xf32> to vector<8x32xf32>
    %2 = arith.truncf %1 : vector<8x32xf32> to vector<8x32xbf16>
    %c0_2 = arith.constant 0 : index
    %c0_3 = arith.constant 0 : index
    %3 = vector.load %arg2[%c0_2, %c0_3] : memref<32x96xbf16, #tpu.memory_space<vmem>>, vector<32x96xbf16>
    %c0_4 = arith.constant 0 : index
    %c0_5 = arith.constant 0 : index
    %4 = vector.load %arg3[%c0_4, %c0_5] : memref<1x96xf32, #tpu.memory_space<vmem>>, vector<1x96xf32>
    %cst = arith.constant dense<0.000000e+00> : vector<8x96xf32>
    %5 = tpu.matmul %2, %3, %cst {dimension_numbers = #tpu.dot_dimension_numbers<[1], [0], [0], [1], [0, 0, 1, 1], [], []>} : vector<8x32xbf16>, vector<32x96xbf16>, vector<8x96xf32> -> vector<8x96xf32>
    %6 = vector.broadcast %4 : vector<1x96xf32> to vector<8x96xf32>
    %7 = arith.addf %5, %6 : vector<8x96xf32>
    %8 = vector.shape_cast %7 : vector<8x96xf32> to vector<1x8x96xf32>
    %9 = vector.extract_strided_slice %8 {offsets = [0, 0, 0], sizes = [1, 8, 32], strides = [1, 1, 1]} : vector<1x8x96xf32> to vector<1x8x32xf32>
    %10 = arith.truncf %9 : vector<1x8x32xf32> to vector<1x8x32xbf16>
    %11 = vector.extract_strided_slice %8 {offsets = [0, 0, 32], sizes = [1, 8, 32], strides = [1, 1, 1]} : vector<1x8x96xf32> to vector<1x8x32xf32>
    %12 = arith.truncf %11 : vector<1x8x32xf32> to vector<1x8x32xbf16>
    %13 = vector.extract_strided_slice %8 {offsets = [0, 0, 64], sizes = [1, 8, 32], strides = [1, 1, 1]} : vector<1x8x96xf32> to vector<1x8x32xf32>
    %14 = arith.truncf %13 : vector<1x8x32xf32> to vector<1x8x32xbf16>
    "tpu.trace_start"() <{level = 10 : i32, message = "bqh,bkh->bqk"}> : () -> ()
    %cst_6 = arith.constant dense<0.000000e+00> : vector<1x8x8xf32>
    %15 = tpu.matmul %10, %12, %cst_6 {dimension_numbers = #tpu.dot_dimension_numbers<[2], [2], [1], [1], [0, 0, 0, 1, 1, 1], [0], [0]>} : vector<1x8x32xbf16>, vector<1x8x32xbf16>, vector<1x8x8xf32> -> vector<1x8x8xf32>
    "tpu.trace_stop"() : () -> ()
    %cst_7 = arith.constant dense<0xFF800000> : vector<1x8xf32>
    %16 = vector.multi_reduction <maximumf>, %15, %cst_7 [2] : vector<1x8x8xf32> to vector<1x8xf32>
    %17 = vector.shape_cast %16 : vector<1x8xf32> to vector<1x8x1xf32>
    %18 = vector.broadcast %17 : vector<1x8x1xf32> to vector<1x8x8xf32>
    %19 = arith.subf %15, %18 : vector<1x8x8xf32>
    %20 = math.exp %19 : vector<1x8x8xf32>
    %cst_8 = arith.constant dense<0.000000e+00> : vector<1x8xf32>
    %21 = vector.multi_reduction <add>, %20, %cst_8 [2] : vector<1x8x8xf32> to vector<1x8xf32>
    %22 = vector.shape_cast %21 : vector<1x8xf32> to vector<1x8x1xf32>
    %23 = tpu.reciprocal %22 {approx = true} : vector<1x8x1xf32> -> vector<1x8x1xf32>
    %24 = vector.broadcast %23 : vector<1x8x1xf32> to vector<1x8x8xf32>
    %25 = arith.mulf %20, %24 : vector<1x8x8xf32>
    %26 = arith.truncf %25 : vector<1x8x8xf32> to vector<1x8x8xbf16>
    "tpu.trace_start"() <{level = 10 : i32, message = "bqk,bkh->bqh"}> : () -> ()
    %cst_9 = arith.constant dense<0.000000e+00> : vector<1x8x32xf32>
    %27 = tpu.matmul %26, %14, %cst_9 {dimension_numbers = #tpu.dot_dimension_numbers<[2], [1], [1], [2], [0, 0, 0, 1, 1, 2], [0], [0]>} : vector<1x8x8xbf16>, vector<1x8x32xbf16>, vector<1x8x32xf32> -> vector<1x8x32xf32>
    "tpu.trace_stop"() : () -> ()
    %c0_10 = arith.constant 0 : index
    %c0_11 = arith.constant 0 : index
    %c0_12 = arith.constant 0 : index
    %28 = vector.load %arg4[%c0_10, %c0_11, %c0_12] : memref<1x8x32xf32, #tpu.memory_space<vmem>>, vector<1x8x32xf32>
    tpu.vector_store %arg4[%c0_10, %c0_11, %c0_12], %27 {strides = array<i32>} : memref<1x8x32xf32, #tpu.memory_space<vmem>>, vector<1x8x32xf32>,
    return
  }
  func.func @transform_0(%arg0: i32) -> (i32, i32, i32) {
    %c0_i32 = arith.constant 0 : i32
    %c0_i32_0 = arith.constant 0 : i32
    %c0_i32_1 = arith.constant 0 : i32
    return %arg0, %c0_i32, %c0_i32_0 : i32, i32, i32
  }
  func.func @transform_1(%arg0: i32) -> (i32, i32) {
    %c0_i32 = arith.constant 0 : i32
    %c0_i32_0 = arith.constant 0 : i32
    %c0_i32_1 = arith.constant 0 : i32
    return %c0_i32, %c0_i32_0 : i32, i32
  }
  func.func @transform_2(%arg0: i32) -> (i32, i32) {
    %c0_i32 = arith.constant 0 : i32
    %c0_i32_0 = arith.constant 0 : i32
    %c0_i32_1 = arith.constant 0 : i32
    return %c0_i32, %c0_i32_0 : i32, i32
  }
  func.func @transform_3(%arg0: i32) -> (i32, i32, i32) {
    %c0_i32 = arith.constant 0 : i32
    %c0_i32_0 = arith.constant 0 : i32
    %c0_i32_1 = arith.constant 0 : i32
    return %arg0, %c0_i32, %c0_i32_0 : i32, i32, i32
  }
}

</mosaic_0001>

<bundles_post_ra>
// kernel: temporal_attention.1
= control target key start
LH: loop header
LB: loop body
LE: loop exit
PB: predicated region body
PF: predicated region fallthrough
CT: control target
= control target key end

     0   :  { %8 = vsyncpa [#allocation3], 0  ;;  %s963_s0 = inlined_call_operand.hbm [shape: f32[2,8,32], index: 0, kind: input, shape index: {}]   ;;  %s964_s1 = inlined_call_operand.hbm [shape: bf16[32,96], index: 1, kind: input, shape index: {}]   ;;  %s965_s2 = inlined_call_operand.vmem [shape: f32[1,96], index: 2, kind: input, shape index: {}]   ;;  %s966_s3 = inlined_call_operand.hbm [shape: f32[2,8,32], index: 3, kind: output, shape index: {}]  }
   0x1   :  { %10 = vsyncpa [#allocation3 + $0x1], 0 }
   0x2   :  { %11 = vsyncpa [#allocation6], 0 }
   0x3   :  { %12 = vsyncpa [#allocation4], 0 }
   0x4   :  { %14 = vsyncpa [#allocation4 + $0x1], 0  ;;  %s753_s12 = smov 0   ;;  %s755_s13 = smov 0  }
   0x5   :  { %s757_s14 = smov 0   ;;  %s759_s15 = smov 0  }
   0x6 LB: > { %s774_s16 = sadd.s32 4294967295, %s722_s15   ;;  %s478_s17 = sadd.s32 4294967294, %s722_s15   ;;  %s722_s15 = sphi %s759_s15, %s986_s15   ;;  %s718_s14 = sphi %s757_s14, %s985_s14   ;;  %s714_s13 = sphi %s755_s13, %s984_s13   ;;  %s710_s12 = sphi %s753_s12, %s983_s12  }
   0x7   : > { %p40_p0 = scmp.ne.s32.totalorder %s714_s13, %s710_s12  ;;  %p967_p1 = scmp.eq.s32.totalorder %s774_s16, 0 }
   0x8   : > { %p112_p3 = scmp.eq.s32.totalorder %s478_s17, 1  ;;  %p479_p5 = scmp.ge.s32.totalorder %s722_s15, 1 }
   0x9   : > { %p783_p4 = por %p967_p1, %p40_p0  ;;  %p119_p7 = scmp.lt.s32.totalorder %s722_s15, 3 }
   0xa   : > { %p788_p6 = por %p112_p3, %p40_p0  ;;  %s724_s21 = smov [#allocation5]  }
   0xb   : > { %s970_s18 = scalar_select %p783_p4, 1, 0 }
   0xc   : > { %s971_s19 = scalar_select %p788_p6, 1, 0 }
   0xd   : > { %p793_p8 = pnand %p479_p5, %p119_p7  ;;  %s131_s22 = sshll.u32 %s724_s21, 4  ;;  %s797_s22 = int_to_ptr.vmem [resolvable:$true] %s131_s22 }
   0xe   : > { %s809_s24 = sadd.s32 1, %s722_s15   ;;  %s27_s25 = sadd.s32 1, %s718_s14 }
   0xf   : > { %s972_s20 = scalar_select %p793_p8, 1, 0 }
  0x10   : > { %p533_p9 = pneg %p793_p8  ;;  %s24_s26 = ssub.s32 %s722_s15, %s809_s24 }
  0x11   : > { %s594_s29 = scalar_lea.hbm %s964_s1, 256 }
  0x12   : > { %p804_p11 = pnand %p533_p9, %p967_p1  ;;  %p595_p12 = scmp.ne.s32.totalorder %s964_s1, %s594_s29 }
  0x13   : > { %p601_p5 = scmp.lt.u32.totalorder %s594_s29, %s964_s1 }
  0x14   : > { %p596_p13 = pneg %p804_p11 }
  0x16   : > { %p597_p0 = pnand %p596_p13, %p595_p12 }
  0x18   : > { %p598_p3 = pneg %p597_p0 }
  0x1a   : > { %p603_p7 = pnand %p601_p5, %p598_p3 }
  0x1c   : > { %606 = shalt.err (!%p603_p7)
}
  0x1d   : > { %s607_s7 = scalar_lea.vmem %s797_s22, 256  ;;  %p615_p2 = scmp.lt.s32.totalorder %s797_s22, %s797_s22 }
  0x1e   : > { %p608_p9 = scmp.ne.s32.totalorder %s797_s22, %s607_s7  ;;  %p616_p6 = scmp.lt.s32.totalorder %s607_s7, %s607_s7 }
  0x20   : > { %p610_p10 = pnand %p608_p9, %p596_p13  ;;  %p617_p4 = por %p616_p6, %p615_p2 }
  0x22   : > { %p611_p1 = pneg %p610_p10 }
  0x24   : > { %p618_p8 = pnand %p617_p4, %p611_p1 }
  0x26   : > { %621 = shalt.err (!%p618_p8)
}
  0x27   : > { %s725_s8 = smov 64   ;;  %s726_s9 = smov 4  }
  0x28   : > { %536 = dma.hbm_to_vmem [thread:$0]  (!%p804_p11), %s964_s1, 256, %s797_s22, [#allocation6], %s725_s8, %s725_s8, %s726_s9  }
  0x29   : > { %p25_p2 = scmp.eq.s32.totalorder %s24_s26, 0  ;;  %p34_p1 = scmp.ne.s32.totalorder %s718_s14, %s714_s13 }
  0x2a   : > { %p35_p4 = scmp.eq.s32.totalorder %s722_s15, 0  ;;  %p546_p6 = scmp.lt.s32.totalorder %s722_s15, 2 }
  0x2b   : > { %s840_s17 = scalar_select %p25_p2, %s718_s14, %s27_s25  }
  0x2c   : > { %p36_p8 = por %p35_p4, %p34_p1  ;;  %p974_p10 = scmp.eq.s32.totalorder %s774_s16, 1 }
  0x2d   : > { %s148_s27 = sand.u32 1, %s718_s14   ;;  %s483_s28 = sshll.u32 %s722_s15, 7 }
  0x2e   : > { %p844_p12 = por %p974_p10, %p34_p1  ;;  %s482_s29 = sshll.u32 %s148_s27, 3 }
  0x2f   : > { %s853_s4 = scalar_lea.hbm %s963_s0, %s483_s28  ;;  %s152_s22 = scalar_lea.vmem [#allocation2], %s482_s29 }
  0x30   : > { %s159_s25 = sshll.u32 %s152_s22, 4  ;;  %p855_p11 = pnand %p546_p6, %p36_p8  ;;  %s859_s25 = int_to_ptr.vmem [resolvable:$true] %s159_s25 }
  0x31   : > { %s149_s5 = scalar_lea.sflag [#allocation3], %s148_s27  ;;  %s622_s6 = scalar_lea.hbm %s853_s4, 128 }
  0x32   : > { %p623_p13 = scmp.ne.s32.totalorder %s853_s4, %s622_s6  ;;  %p624_p0 = pneg %p855_p11 }
  0x33   : > { %s627_s9 = scalar_lea.hbm %s963_s0, 256  ;;  %p628_p7 = scmp.lt.u32.totalorder %s853_s4, %s963_s0 }
  0x34   : > { %p625_p3 = pnand %p624_p0, %p623_p13  ;;  %p629_p9 = scmp.lt.u32.totalorder %s627_s9, %s622_s6 }
  0x35   : > { %p631_p1 = scmp.lt.u32.totalorder %s622_s6, %s853_s4 }
  0x36   : > { %p626_p5 = pneg %p625_p3  ;;  %p630_p2 = por %p629_p9, %p628_p7 }
  0x38   : > { %p632_p4 = por %p631_p1, %p630_p2 }
  0x3a   : > { %p633_p6 = pnand %p632_p4, %p626_p5 }
  0x3c   : > { %636 = shalt.err (!%p633_p6)
}
  0x3d   : > { %s637_s27 = scalar_lea.vmem %s859_s25, 128  ;;  %s727_s28 = smov [#allocation2]  }
  0x3e   : > { %p638_p8 = scmp.ne.s32.totalorder %s859_s25, %s637_s27  ;;  %s642_s29 = sshll.u32 %s727_s28, 4  ;;  %s643_s29 = int_to_ptr.vmem [resolvable:$false] %s642_s29 }
  0x3f   : > { %s644_s23 = scalar_lea.vmem %s643_s29, 256  ;;  %p645_p3 = scmp.lt.s32.totalorder %s859_s25, %s643_s29 }
  0x40   : > { %p640_p10 = pnand %p638_p8, %p624_p0  ;;  %p646_p7 = scmp.lt.s32.totalorder %s644_s23, %s637_s27 }
  0x42   : > { %p641_p13 = pneg %p640_p10  ;;  %p647_p9 = por %p646_p7, %p645_p3 }
  0x44   : > { %p648_p2 = pnand %p647_p9, %p641_p13 }
  0x46   : > { %651 = shalt.err (!%p648_p2)
}
  0x47   : > { %540 = dma.hbm_to_vmem [thread:$0]  (!%p855_p11), %s853_s4, 128, %s859_s25, %s149_s5  }
  0x48   : > { %p977_p5 = scmp.ne.s32.totalorder %s972_s20, 0 }
  0x49   : > { %s889_s30 = sand.u32 (!%p977_p5), 1, %s714_s13   ;;  %p978_p0 = scmp.ne.s32.totalorder (!%p977_p5), %s970_s18, 0 }
  0x4a   : > { %168 = sbr.rel (%p977_p5) target bundleno = 1189 (0x4a5), region = 32  ;;  %s485_s22 = sshll.u32 (!%p977_p5), %s889_s30, 3 }
  0x4b   : > { %s171_s6 = scalar_lea.sflag (!%p977_p5), [#allocation3], %s889_s30  ;;  %s174_s7 = scalar_lea.vmem (!%p977_p5), [#allocation2], %s485_s22 }
  0x51   : > { %697 = dma.done.wait (%p978_p0), %s171_s6, 128  }
  0x52   : > { %699 = vsyncadd (%p978_p0), %s171_s6, 4294967168  ;;  %p979_p11 = scmp.eq.s32.totalorder %s774_s16, 0 }
  0x54   : > { %701 = dma.done.wait (%p979_p11), [#allocation6], 256   ;;  %p980_p1 = pmov %p979_p11 }
  0x55   : > { %v728_v0 = vmov 0.0   ;;  %vm729_vm0 = vmmov 0   ;;  %v588_v1 = vld [vmem:[#allocation5] sm:$0xff]   ;;  %v589_v2 = vld [vmem:[#allocation5 + $0x8] sm:$0xff]   ;;  %v202_v3 = vld [vmem:[%s174_s7] sm:$0xff]  ;;  %vm227_vm1 = vcmask 261120  }
  0x56   : > { %703 = vsyncadd (%p980_p1), [#allocation6], 4294967040  ;;  %505 = vmatprep.subr.bf16.mxu0 %v728_v0  ;;  %509 = vmatprep.mubr.msk.bf16.mxu0 %vm729_vm0, %v728_v0  ;;  %v203_v4 = vpack.c.bf16 %v202_v3, %v202_v3  ;;  %v488_v5 = vld [vmem:[%s965_s2] ss:$0 sm:$0xff]  ;;  %s730_s4 = smov 96   ;;  %vm321_vm2 = vcmask 64512  }
  0x57   : > { %513 = vmatprep.subr.bf16.mxu1 %v728_v0  ;;  %515 = vmatprep.mubr.msk.bf16.mxu1 %vm729_vm0, %v728_v0  ;;  %s731_s25 = smov 64   ;;  %vm339_vm3 = vcmask 1043456   ;;  %s495_s26 = sshll.u32 %s774_s16, 7 }
  0x58   : > { %506 = vmatpush3.bf16.msra.mxu0 %v588_v1  ;;  %s200_s5 = scalar_lea.vmem [#allocation7], %s485_s22  ;;  %s918_s11 = scalar_lea.hbm %s966_s3, %s495_s26 }
  0x59   : > { %507 = vmatprep.subr.bf16.mxu0 %v728_v0  ;;  %s398_s8 = sshll.u32 %s200_s5, 4  ;;  %s385_s27 = scalar_lea.sflag [#allocation4], %s889_s30  ;;  %s920_s8 = int_to_ptr.vmem [resolvable:$true] %s398_s8 }
  0x5a   : > { %s652_s16 = scalar_lea.vmem %s920_s8, 128  ;;  %s732_s28 = smov [#allocation7]  }
  0x5b   : > { %p653_p4 = scmp.ne.s32.totalorder %s920_s8, %s652_s16  ;;  %s656_s29 = sshll.u32 %s732_s28, 4  ;;  %s657_s29 = int_to_ptr.vmem [resolvable:$false] %s656_s29 }
  0x5c   : > { %508 = vmatpush3.bf16.msra.mxu0 %v589_v2  ;;  %s658_s23 = scalar_lea.vmem %s657_s29, 256  ;;  %p659_p10 = scmp.lt.s32.totalorder %s920_s8, %s657_s29 }
  0x5d   : > { %519 = vmatprep.subr.bf16.mxu0 %v728_v0  ;;  %p654_p6 = pnand %p653_p4, %p844_p12  ;;  %p660_p13 = scmp.lt.s32.totalorder %s658_s23, %s652_s16 }
  0x5f   : > { %510 = vmatmul.mubr.msk.bf16.vlgmr.msra.gmra.mrb[0].mxu0 %vm227_vm1, %v203_v4  ;;  %p655_p8 = pneg %p654_p6  ;;  %p661_p3 = por %p660_p13, %p659_p10 }
  0x60   : > { %521 = vmatprep.mubr.msk.bf16.mxu0 %vm729_vm0, %v728_v0 }
  0x61   : > { %p662_p7 = pnand %p661_p3, %p655_p8 }
 0x132   : > { %v265_v6 = vpop.f32.mrb[0].mxu0 }
 0x133   : > { %v266_v7 = vadd.f32 %v488_v5, %v265_v6  ;;  %v511_v8 = vpop.f32.mrb[1].mxu0 }
 0x134   : > { %v268_v9 = vpop.f32.mrb[2].mxu0 }
 0x135   : > { %v271_v10 = vpack.c.bf16 %v266_v7, %v266_v7  ;;  %v512_v11 = vpop.f32.mrb[3].mxu0 }
 0x137   : > { %273 = vrot.lane.b32.xlu0 %v271_v10, %s730_s4 }
 0x1a9   : > { %v274_v12 = vpop.permute.xlu0 %273 }
 0x1aa   : > { %v279_v13 = vsel %vm227_vm1, %v274_v12, 0 }
 0x1ab   : > { %514 = vmatpush3.bf16.xpose.msra.mxu1 %v279_v13 }
 0x1b2   : > { %516 = vmatmul.mubr.msk.bf16.vlgmr.msra.gmra.mrb[0].mxu1 %vm227_vm1, %v271_v10 }
 0x285   : > { %v315_v14 = vpop.f32.mrb[0].mxu1 }
 0x286   : > { %v517_v15 = vpop.f32.mrb[1].mxu1  ;;  %v322_v16 = vsel %vm321_vm2, %v315_v14, -inf }
 0x287   : > { %323 = vmax.xlane.f32.xlu0 %v322_v16  ;;  %v318_v17 = vpop.f32.mrb[2].mxu1 }
 0x288   : > { %v518_v18 = vpop.f32.mrb[3].mxu1 }
 0x314   : > { %v324_v19 = vpop.xlane.xlu0 %323 }
 0x315   : > { %v325_v20 = vsub.f32 %v315_v14, %v324_v19 }
 0x317   : > { %v326_v21 = vmul.f32 1.442695, %v325_v20 }
 0x319   : > { %590 = vpow2.f32 %v326_v21 }
 0x323   : > { %v591_v22 = vpop.eup %590 }
 0x324   : > { %v328_v23 = vsel %vm321_vm2, %v591_v22, 0.0 }
 0x325   : > { %329 = vadd.xlane.f32.xlu1 %v328_v23 }
 0x336   : > { %334 = vrot.lane.b32.xlu1 %v271_v10, %s731_s25 }
 0x3b2   : > { %v330_v24 = vpop.xlane.xlu1 %329 }
 0x3b3   : > { %592 = vrcp.f32 %v330_v24 }
 0x3b6   : > { %v335_v25 = vpop.permute.xlu1 %334 }
 0x3b7   : > { %v341_v26 = vsel %vm339_vm3, %v335_v25, 0 }
 0x3b8   : > { %520 = vmatpush3.bf16.msra.mxu0 %v341_v26 }
 0x3bd   : > { %v593_v27 = vpop.eup %592 }
 0x3be   : > { %v332_v28 = vmul.f32 %v593_v27, %v591_v22 }
 0x3c0   : > { %v333_v29 = vpack.c.bf16 %v332_v28, %v332_v28 }
 0x3c2   : > { %522 = vmatmul.mubr.msk.bf16.vlgmr.msra.gmra.mrb[4].mxu0 %vm321_vm2, %v333_v29 }
 0x495   : > { %v377_v30 = vpop.f32.mrb[4].mxu0 }
 0x496   : > { %383 = vst.msk [vmem:[%s200_s5] sm:$0xff] %vm227_vm1, %v377_v30  ;;  %v523_v31 = vpop.f32.mrb[5].mxu0 }
 0x497   : > { %v380_v32 = vpop.f32.mrb[6].mxu0 }
 0x498   : > { %665 = shalt.err (!%p662_p7)
}
 0x499   : > { %s666_s30 = scalar_lea.hbm %s918_s11, 128  ;;  %s670_s7 = scalar_lea.hbm %s966_s3, 256 }
 0x49a   : > { %p667_p9 = scmp.ne.s32.totalorder %s918_s11, %s666_s30  ;;  %p671_p0 = scmp.lt.u32.totalorder %s918_s11, %s966_s3 }
 0x49b   : > { %p672_p11 = scmp.lt.u32.totalorder %s670_s7, %s666_s30  ;;  %p674_p4 = scmp.lt.u32.totalorder %s666_s30, %s918_s11 }
 0x49c   : > { %p668_p2 = pnand %p667_p9, %p844_p12 }
 0x49d   : > { %p673_p1 = por %p672_p11, %p671_p0 }
 0x49e   : > { %p669_p5 = pneg %p668_p2 }
 0x49f   : > { %p675_p6 = por %p674_p4, %p673_p1 }
 0x4a1   : > { %p676_p8 = pnand %p675_p6, %p669_p5 }
 0x4a3   : > { %679 = shalt.err (!%p676_p8)
}
 0x4a4   : > { %531 = dma.vmem_to_hbm [thread:$0]  (%p844_p12), %s920_s8, 128, %s918_s11, %s385_s27   ;;  %v524_v33 = vpop.f32.mrb[7].mxu0 }
 0x4a5 PF: > { %s410_s4 = sand.u32 1, %s710_s12   ;;  %p981_p10 = scmp.ne.s32.totalorder %s971_s19, 0 }
 0x4a6   : > { %p982_p13 = scmp.ge.s32.totalorder %s722_s15, 2  ;;  %s411_s25 = scalar_lea.sflag [#allocation4], %s410_s4 }
 0x4a8   : > { %p542_p3 = pnand %p982_p13, %p981_p10 }
 0x4aa   : > { %705 = dma.done.wait (!%p542_p3), %s411_s25, 128  }
 0x4ab   : > { %707 = vsyncadd (!%p542_p3), %s411_s25, 4294967168  ;;  %p17_p7 = scmp.ge.s32.totalorder %s809_s24, 4   ;;  %s983_s12 = smov %s714_s13 }
 0x4ac   : > { %s984_s13 = smov %s718_s14  ;;  %s985_s14 = smov %s840_s17 }
 0x4ad   : > { %s986_s15 = smov %s809_s24  ;;  %19 = sbr.rel (!%p17_p7) target bundleno = 6 (0x6), region = 81 }
 0x4b4   :  { %416 = vsyncpa [#allocation3], 1 }
 0x4b5   :  { %418 = vsyncpa [#allocation3 + $0x1], 1 }
 0x4b6   :  { %419 = vsyncpa [#allocation6], 1 }
 0x4b7   :  { %420 = vsyncpa [#allocation4], 1 }
 0x4b8   :  { %422 = vsyncpa [#allocation4 + $0x1], 1 }

</bundles_post_ra>
